<compile_context>
chip_gen: v6e
topology: v6e:2x2x1
jax: 0.10.0
libtpu: 0.0.40
codegen_flags: <defaults>
</compile_context>

<pallas_src>
import math

import jax
import jax.numpy as jnp
from jax.experimental import pallas as pl
from jax.experimental.pallas import tpu as pltpu

# ---- small synthetic Gemma config ----
HIDDEN_SIZE = 32
NUM_HEADS = 4
HEAD_DIM = 8
NUM_KV_HEADS = 2
NUM_KV_GROUPS = NUM_HEADS // NUM_KV_HEADS
MAX_POS = 2048
ROPE_THETA = 10000.0
BATCH = 2
SEQ = 8
SCALE = HEAD_DIM ** -0.5
HALF = HEAD_DIM // 2


def gemma_attn_kernel(xbd_ref, rope_ref, w_all_ref, wo_t_ref,
                      bdm_ref, bias_ref, scat_ref, o_ref):
    """One grid step == one batch element (grid=(B,), 'parallel').

    xbd_ref:   (1, NH*S, NH*H)  bf16  block-diagonal replica of x (wrapper-built)
    rope_ref:  (1, NH*S, 2*D)   f32   [cos | pre-signed sin], head-stacked layout
    w_all_ref: (NH*H, 5*D)      bf16  per-head [Wq*SCALE | Wq_rolled*SCALE | Wk | Wk_rolled | Wv]
    wo_t_ref:  (NH*D, H)        bf16  o_proj weight, (in, out)
    bdm_ref:   (NH*S, NH*D)     f32   0/1 block-diag mask for the o_proj expansion
    bias_ref:  (NH*S, NH*S)     f32   additive causal + head-block bias (0 / -1e30)
    scat_ref:  (S, S*H)         f32   0/1 scatter mask for the lane-dense output row
    o_ref:     (1, 1, S*H)      f32   lane-dense output row
    """
    D = HEAD_DIM
    S = SEQ

    # ---- fused QKV (+ pre-rolled q/k columns) for all heads: ONE MXU push ----
    qkv = jnp.dot(xbd_ref[0], w_all_ref[...],
                  preferred_element_type=jnp.float32)        # (NH*S, 5D) f32

    rope = rope_ref[0]                                       # (NH*S, 2D) f32
    cos = rope[:, :D]
    sin_s = rope[:, D:]                                      # pre-signed sin

    # ---- RoPE: 2 vmuls + 1 vadd per tensor (rotate_half folded into weights) ----
    q = qkv[:, 0 * D:1 * D] * cos + qkv[:, 1 * D:2 * D] * sin_s   # (NH*S, D) f32
    k = qkv[:, 2 * D:3 * D] * cos + qkv[:, 3 * D:4 * D] * sin_s   # (NH*S, D) f32 (GQA-repeated)
    v = qkv[:, 4 * D:5 * D]                                       # (NH*S, D) f32 (GQA-repeated)

    # ---- one score matmul for all heads + precomputed additive bias ----
    # SCALE is already folded into the q weight columns.
    s = jnp.dot(q.astype(jnp.bfloat16), k.astype(jnp.bfloat16).T,
                preferred_element_type=jnp.float32) + bias_ref[...]   # (NH*S, NH*S)

    # ---- one softmax (f32), reciprocal on the EUP ----
    m = jnp.max(s, axis=-1, keepdims=True)
    p = jnp.exp(s - m)
    p = p * pl.reciprocal(jnp.sum(p, axis=-1, keepdims=True), approx=True)

    # ---- one P@V for all heads ----
    attn = jnp.dot(p.astype(jnp.bfloat16), v.astype(jnp.bfloat16),
                   preferred_element_type=jnp.float32)        # (NH*S, D) f32

    # ---- o_proj: block-diag expansion via precomputed mask (one vmul + cast) ----
    attn_bd = (jnp.concatenate([attn] * NUM_HEADS, axis=1)
               * bdm_ref[...]).astype(jnp.bfloat16)            # (NH*S, NH*D) bf16
    per_head = jnp.dot(attn_bd, wo_t_ref[...],
                       preferred_element_type=jnp.float32)     # (NH*S, H) f32

    # ---- head-sum on an (S, H) tile: 3 static-slice vadds ----
    out_sh = per_head[0:S, :]
    for h in range(1, NUM_HEADS):
        out_sh = out_sh + per_head[h * S:(h + 1) * S, :]       # (S, H)

    # ---- lane-dense scatter on (S, S*H): one vmul + 8-row reduce ----
    wide = jnp.concatenate([out_sh] * S, axis=1)               # (S, S*H)
    out_flat = jnp.sum(wide * scat_ref[...], axis=0, keepdims=True)   # (1, S*H)
    o_ref[0] = out_flat.astype(o_ref.dtype)


def gemma_attention(hidden_states, position_ids, wq, wk, wv, wo):
    """hidden_states: (B, S, H) fp32; position_ids: (B, S) int32.
    wq/wk/wv/wo are PyTorch-convention (out_features, in_features) weights."""
    B, S, H = hidden_states.shape
    D = HEAD_DIM
    NHS = NUM_HEADS * S

    # --- GemmaRotaryEmbedding (cheap elementwise glue kept outside the kernel, f32) ---
    inv_freq = 1.0 / (ROPE_THETA ** (jnp.arange(0, D, 2, dtype=jnp.float32) / D))   # (D/2,)
    freqs = position_ids.astype(jnp.float32)[:, :, None] * inv_freq[None, None, :]   # (B,S,D/2)
    cos = jnp.cos(jnp.concatenate([freqs, freqs], axis=-1))                          # (B,S,D)
    sin_h = jnp.sin(freqs)                                                           # (B,S,D/2)
    sin_signed = jnp.concatenate([-sin_h, sin_h], axis=-1)                           # pre-signed sin
    # Pre-tile to the head-stacked (NH*S, D) layout and pack cos|sin into one input.
    rope_tab = jnp.concatenate([jnp.tile(cos, (1, NUM_HEADS, 1)),
                                jnp.tile(sin_signed, (1, NUM_HEADS, 1))], axis=-1)   # (B,NH*S,2D)

    # --- fused, head-stacked QKV weight (bf16): SCALE and rotate_half folded in ---
    wq_t, wk_t, wv_t = wq.T, wk.T, wv.T       # (in, out) convention
    blocks = []
    for h in range(NUM_HEADS):
        g = h // NUM_KV_GROUPS                # GQA: contiguous groups share a kv head
        wq_h = wq_t[:, h * D:(h + 1) * D] * SCALE
        wk_g = wk_t[:, g * D:(g + 1) * D]
        wv_g = wv_t[:, g * D:(g + 1) * D]
        # "rolled" columns: col j holds original col (j+HALF)%D, so that
        # rolled_result * pre-signed-sin == rotate_half(result) * sin.
        wq_r = jnp.concatenate([wq_h[:, HALF:], wq_h[:, :HALF]], axis=1)
        wk_r = jnp.concatenate([wk_g[:, HALF:], wk_g[:, :HALF]], axis=1)
        blocks.append(jnp.concatenate([wq_h, wq_r, wk_g, wk_r, wv_g], axis=1))        # (H, 5D)
    w_all = jnp.concatenate(blocks, axis=0).astype(jnp.bfloat16)                      # (NH*H, 5D)
    wo_t = wo.T.astype(jnp.bfloat16)                                                  # (NH*D, H)

    # --- block-diagonal replica of x, built in the wrapper (bf16, 8 KB/batch) ---
    xb = hidden_states.astype(jnp.bfloat16)                                           # (B,S,H)
    eye_h = jnp.eye(NUM_HEADS, dtype=jnp.bfloat16)                                    # (NH,NH)
    x_bd = (eye_h[None, :, None, :, None] * xb[:, None, :, None, :]
            ).reshape(B, NHS, NUM_HEADS * H)                                          # (B,NH*S,NH*H)

    # --- precomputed static masks (constant index_maps -> DMA'd once) ---
    r = jnp.arange(NHS)
    same_head = (r[:, None] // S) == (r[None, :] // S)
    causal = (r[:, None] % S) >= (r[None, :] % S)
    bias = jnp.where(same_head & causal, 0.0, -1e30).astype(jnp.float32)              # (NH*S,NH*S)

    cc = jnp.arange(NUM_HEADS * D)
    bd_mask = ((r[:, None] // S) == (cc[None, :] // D)).astype(jnp.float32)           # (NH*S,NH*D)

    ss = jnp.arange(S)
    cf = jnp.arange(S * H)
    scat = ((cf[None, :] // H) == ss[:, None]).astype(jnp.float32)                    # (S,S*H)

    out_flat = pl.pallas_call(
        gemma_attn_kernel,
        out_shape=jax.ShapeDtypeStruct((B, 1, S * H), hidden_states.dtype),
        grid_spec=pltpu.PrefetchScalarGridSpec(
            num_scalar_prefetch=0,
            grid=(B,),                                   # "parallel": v7x runs one batch per TC
            in_specs=[
                pl.BlockSpec((1, NHS, NUM_HEADS * H), lambda b: (b, 0, 0)),
                pl.BlockSpec((1, NHS, 2 * D), lambda b: (b, 0, 0)),
                pl.BlockSpec((NUM_HEADS * H, 5 * D), lambda b: (0, 0)),
                pl.BlockSpec((NUM_HEADS * D, H), lambda b: (0, 0)),
                pl.BlockSpec((NHS, NUM_HEADS * D), lambda b: (0, 0)),
                pl.BlockSpec((NHS, NHS), lambda b: (0, 0)),
                pl.BlockSpec((S, S * H), lambda b: (0, 0)),
            ],
            out_specs=pl.BlockSpec((1, 1, S * H), lambda b: (b, 0, 0)),   # lane-dense rows
        ),
        compiler_params=pltpu.CompilerParams(dimension_semantics=("parallel",)),
    )(x_bd, rope_tab, w_all, wo_t, bd_mask, bias, scat)
    return out_flat.reshape(B, S, H)


def _reference(hidden_states, position_ids, wq, wk, wv, wo):
    """Pure-JAX f32 reference mirroring HF Gemma eager attention."""
    B, S, H = hidden_states.shape
    D = HEAD_DIM
    inv_freq = 1.0 / (ROPE_THETA ** (jnp.arange(0, D, 2, dtype=jnp.float32) / D))
    freqs = position_ids.astype(jnp.float32)[:, :, None] * inv_freq[None, None, :]
    emb = jnp.concatenate([freqs, freqs], axis=-1)
    cos, sin = jnp.cos(emb), jnp.sin(emb)

    q = (hidden_states @ wq.T).reshape(B, S, NUM_HEADS, D).transpose(0, 2, 1, 3)
    k = (hidden_states @ wk.T).reshape(B, S, NUM_KV_HEADS, D).transpose(0, 2, 1, 3)
    v = (hidden_states @ wv.T).reshape(B, S, NUM_KV_HEADS, D).transpose(0, 2, 1, 3)

    def rot_half(x):
        return jnp.concatenate([-x[..., HALF:], x[..., :HALF]], axis=-1)

    q = q * cos[:, None] + rot_half(q) * sin[:, None]
    k = k * cos[:, None] + rot_half(k) * sin[:, None]
    k = jnp.repeat(k, NUM_KV_GROUPS, axis=1)
    v = jnp.repeat(v, NUM_KV_GROUPS, axis=1)

    s = jnp.einsum("bhqd,bhkd->bhqk", q, k) * SCALE
    mask = jnp.tril(jnp.ones((S, S), dtype=bool))
    s = jnp.where(mask[None, None], s, jnp.finfo(jnp.float32).min)
    p = jax.nn.softmax(s, axis=-1)
    o = jnp.einsum("bhqk,bhkd->bhqd", p, v).transpose(0, 2, 1, 3).reshape(B, S, NUM_HEADS * D)
    return o @ wo.T


if __name__ == "__main__":
    key = jax.random.PRNGKey(0)
    k_x, k_q, k_k, k_v, k_o = jax.random.split(key, 5)

    hidden_states = jax.random.normal(k_x, (BATCH, SEQ, HIDDEN_SIZE), dtype=jnp.float32)
    position_ids = jnp.broadcast_to(jnp.arange(SEQ, dtype=jnp.int32)[None, :], (BATCH, SEQ))

    # deterministic parameter init (nn.Linear convention: (out_features, in_features), bias=False)
    wq = jax.random.normal(k_q, (NUM_HEADS * HEAD_DIM, HIDDEN_SIZE), dtype=jnp.float32) * 0.1
    wk = jax.random.normal(k_k, (NUM_KV_HEADS * HEAD_DIM, HIDDEN_SIZE), dtype=jnp.float32) * 0.1
    wv = jax.random.normal(k_v, (NUM_KV_HEADS * HEAD_DIM, HIDDEN_SIZE), dtype=jnp.float32) * 0.1
    wo = jax.random.normal(k_o, (HIDDEN_SIZE, NUM_HEADS * HEAD_DIM), dtype=jnp.float32) * 0.1

    out = gemma_attention(hidden_states, position_ids, wq, wk, wv, wo)
    out = jax.block_until_ready(out)

    ref = _reference(hidden_states, position_ids, wq, wk, wv, wo)
    assert out.shape == (BATCH, SEQ, HIDDEN_SIZE)
    # bf16 MXU operands (f32 accumulate) + approx EUP reciprocal in the softmax
    # => looser tolerance than a pure-f32 path (documented; don't tighten).
    assert jnp.allclose(out, ref, rtol=2e-2, atol=1e-2), "mismatch vs reference"

    # TODO(synk): attention_mask / KV-cache / dropout of the full HF forward are not modeled
    # (module forward is abstract); only the canonical causal self-attention prefill path is
    # implemented.
    print("KERNEL_OK")
</pallas_src>

<mosaic_0001>
module attributes {stable_mosaic.version = 11 : i64} {
  func.func @gemma_attn_kernel(%arg0: i32, %arg1: memref<1x32x128xbf16, #tpu.memory_space<vmem>>, %arg2: memref<1x32x16xf32, #tpu.memory_space<vmem>>, %arg3: memref<128x40xbf16, #tpu.memory_space<vmem>>, %arg4: memref<32x32xbf16, #tpu.memory_space<vmem>>, %arg5: memref<32x32xf32, #tpu.memory_space<vmem>>, %arg6: memref<32x32xf32, #tpu.memory_space<vmem>>, %arg7: memref<8x256xf32, #tpu.memory_space<vmem>>, %arg8: memref<1x1x256xf32, #tpu.memory_space<vmem>>) attributes {dimension_semantics = [#tpu.dimension_semantics<parallel>], iteration_bounds = array<i64: 2>, scalar_prefetch = 0 : i64, scratch_operands = 0 : i64, tpu.core_type = #tpu.core_type<tc>, window_params = [{transform_indices = @transform_0, window_bounds = array<i64: 1, 32, 128>}, {transform_indices = @transform_1, window_bounds = array<i64: 1, 32, 16>}, {pipeline_mode = #tpu.pipeline_mode<synchronous>, transform_indices = @transform_2, window_bounds = array<i64: 128, 40>}, {pipeline_mode = #tpu.pipeline_mode<synchronous>, transform_indices = @transform_3, window_bounds = array<i64: 32, 32>}, {pipeline_mode = #tpu.pipeline_mode<synchronous>, transform_indices = @transform_4, window_bounds = array<i64: 32, 32>}, {pipeline_mode = #tpu.pipeline_mode<synchronous>, transform_indices = @transform_5, window_bounds = array<i64: 32, 32>}, {pipeline_mode = #tpu.pipeline_mode<synchronous>, transform_indices = @transform_6, window_bounds = array<i64: 8, 256>}, {transform_indices = @transform_7, window_bounds = array<i64: 1, 1, 256>}]} {
    %c0 = arith.constant 0 : index
    %c0_0 = arith.constant 0 : index
    %c0_1 = arith.constant 0 : index
    %0 = vector.load %arg1[%c0, %c0_0, %c0_1] : memref<1x32x128xbf16, #tpu.memory_space<vmem>>, vector<1x32x128xbf16>
    %1 = vector.shape_cast %0 : vector<1x32x128xbf16> to vector<32x128xbf16>
    %c0_2 = arith.constant 0 : index
    %c0_3 = arith.constant 0 : index
    %2 = vector.load %arg3[%c0_2, %c0_3] : memref<128x40xbf16, #tpu.memory_space<vmem>>, vector<128x40xbf16>
    %cst = arith.constant dense<0.000000e+00> : vector<32x40xf32>
    %3 = tpu.matmul %1, %2, %cst {dimension_numbers = #tpu.dot_dimension_numbers<[1], [0], [0], [1], [0, 0, 1, 1], [], []>} : vector<32x128xbf16>, vector<128x40xbf16>, vector<32x40xf32> -> vector<32x40xf32>
    %c0_4 = arith.constant 0 : index
    %c0_5 = arith.constant 0 : index
    %c0_6 = arith.constant 0 : index
    %4 = vector.load %arg2[%c0_4, %c0_5, %c0_6] : memref<1x32x16xf32, #tpu.memory_space<vmem>>, vector<1x32x16xf32>
    %5 = vector.shape_cast %4 : vector<1x32x16xf32> to vector<32x16xf32>
    %6 = vector.extract_strided_slice %5 {offsets = [0, 0], sizes = [32, 8], strides = [1, 1]} : vector<32x16xf32> to vector<32x8xf32>
    %7 = vector.extract_strided_slice %5 {offsets = [0, 8], sizes = [32, 8], strides = [1, 1]} : vector<32x16xf32> to vector<32x8xf32>
    %8 = vector.extract_strided_slice %3 {offsets = [0, 0], sizes = [32, 8], strides = [1, 1]} : vector<32x40xf32> to vector<32x8xf32>
    %9 = arith.mulf %8, %6 : vector<32x8xf32>
    %10 = vector.extract_strided_slice %3 {offsets = [0, 8], sizes = [32, 8], strides = [1, 1]} : vector<32x40xf32> to vector<32x8xf32>
    %11 = arith.mulf %10, %7 : vector<32x8xf32>
    %12 = arith.addf %9, %11 : vector<32x8xf32>
    %13 = vector.extract_strided_slice %3 {offsets = [0, 16], sizes = [32, 8], strides = [1, 1]} : vector<32x40xf32> to vector<32x8xf32>
    %14 = arith.mulf %13, %6 : vector<32x8xf32>
    %15 = vector.extract_strided_slice %3 {offsets = [0, 24], sizes = [32, 8], strides = [1, 1]} : vector<32x40xf32> to vector<32x8xf32>
    %16 = arith.mulf %15, %7 : vector<32x8xf32>
    %17 = arith.addf %14, %16 : vector<32x8xf32>
    %18 = vector.extract_strided_slice %3 {offsets = [0, 32], sizes = [32, 8], strides = [1, 1]} : vector<32x40xf32> to vector<32x8xf32>
    %19 = arith.truncf %12 : vector<32x8xf32> to vector<32x8xbf16>
    %20 = arith.truncf %17 : vector<32x8xf32> to vector<32x8xbf16>
    %21 = tpu.transpose %20, [1, 0] : vector<32x8xbf16> -> vector<8x32xbf16>
    %cst_7 = arith.constant dense<0.000000e+00> : vector<32x32xf32>
    %22 = tpu.matmul %19, %21, %cst_7 {dimension_numbers = #tpu.dot_dimension_numbers<[1], [0], [0], [1], [0, 0, 1, 1], [], []>} : vector<32x8xbf16>, vector<8x32xbf16>, vector<32x32xf32> -> vector<32x32xf32>
    %c0_8 = arith.constant 0 : index
    %c0_9 = arith.constant 0 : index
    %23 = vector.load %arg6[%c0_8, %c0_9] : memref<32x32xf32, #tpu.memory_space<vmem>>, vector<32x32xf32>
    %24 = arith.addf %22, %23 : vector<32x32xf32>
    %cst_10 = arith.constant dense<0xFF800000> : vector<32xf32>
    %25 = vector.multi_reduction <maximumf>, %24, %cst_10 [1] : vector<32x32xf32> to vector<32xf32>
    %26 = vector.shape_cast %25 : vector<32xf32> to vector<32x1xf32>
    %27 = vector.broadcast %26 : vector<32x1xf32> to vector<32x32xf32>
    %28 = arith.subf %24, %27 : vector<32x32xf32>
    %29 = math.exp %28 : vector<32x32xf32>
    %cst_11 = arith.constant dense<0.000000e+00> : vector<32xf32>
    %30 = vector.multi_reduction <add>, %29, %cst_11 [1] : vector<32x32xf32> to vector<32xf32>
    %31 = vector.shape_cast %30 : vector<32xf32> to vector<32x1xf32>
    %32 = tpu.reciprocal %31 {approx = true} : vector<32x1xf32> -> vector<32x1xf32>
    %33 = vector.broadcast %32 : vector<32x1xf32> to vector<32x32xf32>
    %34 = arith.mulf %29, %33 : vector<32x32xf32>
    %35 = arith.truncf %34 : vector<32x32xf32> to vector<32x32xbf16>
    %36 = arith.truncf %18 : vector<32x8xf32> to vector<32x8xbf16>
    %cst_12 = arith.constant dense<0.000000e+00> : vector<32x8xf32>
    %37 = tpu.matmul %35, %36, %cst_12 {dimension_numbers = #tpu.dot_dimension_numbers<[1], [0], [0], [1], [0, 0, 1, 1], [], []>} : vector<32x32xbf16>, vector<32x8xbf16>, vector<32x8xf32> -> vector<32x8xf32>
    %38 = tpu.concatenate %37, %37, %37, %37 in 1 : vector<32x8xf32>, vector<32x8xf32>, vector<32x8xf32>, vector<32x8xf32> -> vector<32x32xf32>
    %c0_13 = arith.constant 0 : index
    %c0_14 = arith.constant 0 : index
    %39 = vector.load %arg5[%c0_13, %c0_14] : memref<32x32xf32, #tpu.memory_space<vmem>>, vector<32x32xf32>
    %40 = arith.mulf %38, %39 : vector<32x32xf32>
    %41 = arith.truncf %40 : vector<32x32xf32> to vector<32x32xbf16>
    %c0_15 = arith.constant 0 : index
    %c0_16 = arith.constant 0 : index
    %42 = vector.load %arg4[%c0_15, %c0_16] : memref<32x32xbf16, #tpu.memory_space<vmem>>, vector<32x32xbf16>
    %cst_17 = arith.constant dense<0.000000e+00> : vector<32x32xf32>
    %43 = tpu.matmul %41, %42, %cst_17 {dimension_numbers = #tpu.dot_dimension_numbers<[1], [0], [0], [1], [0, 0, 1, 1], [], []>} : vector<32x32xbf16>, vector<32x32xbf16>, vector<32x32xf32> -> vector<32x32xf32>
    %44 = vector.extract_strided_slice %43 {offsets = [0, 0], sizes = [8, 32], strides = [1, 1]} : vector<32x32xf32> to vector<8x32xf32>
    %45 = vector.extract_strided_slice %43 {offsets = [8, 0], sizes = [8, 32], strides = [1, 1]} : vector<32x32xf32> to vector<8x32xf32>
    %46 = arith.addf %44, %45 : vector<8x32xf32>
    %47 = vector.extract_strided_slice %43 {offsets = [16, 0], sizes = [8, 32], strides = [1, 1]} : vector<32x32xf32> to vector<8x32xf32>
    %48 = arith.addf %46, %47 : vector<8x32xf32>
    %49 = vector.extract_strided_slice %43 {offsets = [24, 0], sizes = [8, 32], strides = [1, 1]} : vector<32x32xf32> to vector<8x32xf32>
    %50 = arith.addf %48, %49 : vector<8x32xf32>
    %51 = tpu.concatenate %50, %50, %50, %50, %50, %50, %50, %50 in 1 : vector<8x32xf32>, vector<8x32xf32>, vector<8x32xf32>, vector<8x32xf32>, vector<8x32xf32>, vector<8x32xf32>, vector<8x32xf32>, vector<8x32xf32> -> vector<8x256xf32>
    %c0_18 = arith.constant 0 : index
    %c0_19 = arith.constant 0 : index
    %52 = vector.load %arg7[%c0_18, %c0_19] : memref<8x256xf32, #tpu.memory_space<vmem>>, vector<8x256xf32>
    %53 = arith.mulf %51, %52 : vector<8x256xf32>
    %cst_20 = arith.constant dense<0.000000e+00> : vector<256xf32>
    %54 = vector.multi_reduction <add>, %53, %cst_20 [0] : vector<8x256xf32> to vector<256xf32>
    %55 = vector.shape_cast %54 : vector<256xf32> to vector<1x256xf32>
    %c0_21 = arith.constant 0 : index
    %c0_22 = arith.constant 0 : index
    %c0_23 = arith.constant 0 : index
    %56 = vector.load %arg8[%c0_21, %c0_22, %c0_23] : memref<1x1x256xf32, #tpu.memory_space<vmem>>, vector<1x1x256xf32>
    %57 = vector.shape_cast %56 : vector<1x1x256xf32> to vector<1x256xf32>
    %58 = vector.shape_cast %55 : vector<1x256xf32> to vector<1x1x256xf32>
    tpu.vector_store %arg8[%c0_21, %c0_22, %c0_23], %58 {strides = array<i32>} : memref<1x1x256xf32, #tpu.memory_space<vmem>>, vector<1x1x256xf32>,
    return
  }
  func.func @transform_0(%arg0: i32) -> (i32, i32, i32) {
    %c0_i32 = arith.constant 0 : i32
    %c0_i32_0 = arith.constant 0 : i32
    %c0_i32_1 = arith.constant 0 : i32
    return %arg0, %c0_i32, %c0_i32_0 : i32, i32, i32
  }
  func.func @transform_1(%arg0: i32) -> (i32, i32, i32) {
    %c0_i32 = arith.constant 0 : i32
    %c0_i32_0 = arith.constant 0 : i32
    %c0_i32_1 = arith.constant 0 : i32
    return %arg0, %c0_i32, %c0_i32_0 : i32, i32, i32
  }
  func.func @transform_2(%arg0: i32) -> (i32, i32) {
    %c0_i32 = arith.constant 0 : i32
    %c0_i32_0 = arith.constant 0 : i32
    %c0_i32_1 = arith.constant 0 : i32
    return %c0_i32, %c0_i32_0 : i32, i32
  }
  func.func @transform_3(%arg0: i32) -> (i32, i32) {
    %c0_i32 = arith.constant 0 : i32
    %c0_i32_0 = arith.constant 0 : i32
    %c0_i32_1 = arith.constant 0 : i32
    return %c0_i32, %c0_i32_0 : i32, i32
  }
  func.func @transform_4(%arg0: i32) -> (i32, i32) {
    %c0_i32 = arith.constant 0 : i32
    %c0_i32_0 = arith.constant 0 : i32
    %c0_i32_1 = arith.constant 0 : i32
    return %c0_i32, %c0_i32_0 : i32, i32
  }
  func.func @transform_5(%arg0: i32) -> (i32, i32) {
    %c0_i32 = arith.constant 0 : i32
    %c0_i32_0 = arith.constant 0 : i32
    %c0_i32_1 = arith.constant 0 : i32
    return %c0_i32, %c0_i32_0 : i32, i32
  }
  func.func @transform_6(%arg0: i32) -> (i32, i32) {
    %c0_i32 = arith.constant 0 : i32
    %c0_i32_0 = arith.constant 0 : i32
    %c0_i32_1 = arith.constant 0 : i32
    return %c0_i32, %c0_i32_0 : i32, i32
  }
  func.func @transform_7(%arg0: i32) -> (i32, i32, i32) {
    %c0_i32 = arith.constant 0 : i32
    %c0_i32_0 = arith.constant 0 : i32
    %c0_i32_1 = arith.constant 0 : i32
    return %arg0, %c0_i32, %c0_i32_0 : i32, i32, i32
  }
}

</mosaic_0001>

<bundles_post_ra>
// kernel: tpu_custom_call.1
= control target key start
LH: loop header
LB: loop body
LE: loop exit
PB: predicated region body
PF: predicated region fallthrough
CT: control target
= control target key end

     0   :  { %12 = vsyncpa [#allocation3], 0  ;;  %s1482_s0 = inlined_call_operand.vmem [shape: bf16[2,32,128], index: 0, kind: input, shape index: {}]   ;;  %s1483_s1 = inlined_call_operand.vmem [shape: f32[2,32,16], index: 1, kind: input, shape index: {}]   ;;  %s1484_s2 = inlined_call_operand.vmem [shape: bf16[128,40], index: 2, kind: input, shape index: {}]   ;;  %s1485_s3 = inlined_call_operand.vmem [shape: bf16[32,32], index: 3, kind: input, shape index: {}]   ;;  %s1486_s4 = inlined_call_operand.vmem [shape: f32[32,32], index: 4, kind: input, shape index: {}]   ;;  %s1487_s5 = inlined_call_operand.vmem [shape: f32[32,32], index: 5, kind: input, shape index: {}]   ;;  %s1488_s6 = inlined_call_operand.vmem [shape: f32[8,256], index: 6, kind: input, shape index: {}]   ;;  %s1489_s7 = inlined_call_operand.hbm [shape: f32[2,1,256], index: 7, kind: output, shape index: {}]  }
   0x1   :  { %14 = vsyncpa [#allocation3 + $0x1], 0  ;;  %s1252_s24 = smov 0   ;;  %s1254_s25 = smov 0  }
   0x2   :  { %s1256_s26 = smov 0   ;;  %s1258_s27 = smov 0  }
   0x3 LB: > { %s1273_s28 = sadd.s32 4294967295, %s1200_s27   ;;  %s961_s29 = sadd.s32 4294967294, %s1200_s27   ;;  %s1200_s27 = sphi %s1258_s27, %s1495_s27   ;;  %s1196_s26 = sphi %s1256_s26, %s1494_s26   ;;  %s1192_s25 = sphi %s1254_s25, %s1493_s25   ;;  %s1188_s24 = sphi %s1252_s24, %s1492_s24  }
   0x4   : > { %s1277_s30 = sadd.s32 1, %s1200_s27   ;;  %s184_s8 = sadd.s32 1, %s1196_s26 }
   0x5   : > { %s181_s9 = ssub.s32 %s1200_s27, %s1277_s30  ;;  %p194_p0 = scmp.ne.s32.totalorder %s1196_s26, %s1192_s25 }
   0x6   : > { %p182_p1 = scmp.eq.s32.totalorder %s181_s9, 0  ;;  %p195_p2 = scmp.eq.s32.totalorder %s1273_s28, 1 }
   0x7   : > { %p200_p3 = scmp.ne.s32.totalorder %s1192_s25, %s1188_s24  ;;  %p201_p4 = scmp.eq.s32.totalorder %s961_s29, 1 }
   0x8   : > { %s1288_s10 = scalar_select %p182_p1, %s1196_s26, %s184_s8  }
   0x9   : > { %p1290_p5 = por %p195_p2, %p194_p0  ;;  %p1294_p6 = por %p201_p4, %p200_p3 }
   0xa   : > { %p964_p7 = scmp.ge.s32.totalorder %s1200_s27, 1  ;;  %p250_p8 = scmp.lt.s32.totalorder %s1200_s27, 3 }
   0xc   : > { %p251_p9 = pnand %p964_p7, %p250_p8 }
   0xd   : > { %p287_p10 = scmp.lt.s32.totalorder (!%p251_p9), %s1273_s28, 1  ;;  %s1203_s9 = smov (!%p251_p9), 120  }
   0xe   : > { %254 = sbr.rel (%p251_p9) target bundleno = 1722 (0x6ba), region = 48  ;;  %s1205_s22 = smov (!%p251_p9), 96  }
   0xf   : > { %s1208_s8 = smov (!%p251_p9), 64  }
  0x13   : > { %v1112_v0 = vld [vmem:[%s1484_s2 + $0x38] sm:$0xff]   ;;  %v1113_v1 = vld [vmem:[%s1484_s2 + $0x30] sm:$0xff]   ;;  %s288_s17 = scalar_select %p287_p10, %s1273_s28, 1  ;;  %v1114_v2 = vld [vmem:[%s1484_s2 + $0x28] sm:$0xff]   ;;  %vm509_vm0 = vcmask 64512   ;;  %vm571_vm1 = vcmask 261120  }
  0x14   : > { %1018 = vmatprep.subr.bf16.mxu0 %v1112_v0  ;;  %v1115_v3 = vld [vmem:[%s1484_s2 + $0x20] sm:$0xff]   ;;  %v1116_v7 = vld [vmem:[%s1484_s2 + $0x18] sm:$0xff]   ;;  %v1117_v10 = vld [vmem:[%s1484_s2 + $0x10] sm:$0xff]   ;;  %vm732_vm2 = vcmask 195584   ;;  %vm727_vm3 = vcmask 130048   ;;  %vm832_vm4 = vcmask 523264  }
  0x15   : > { %1019 = vmatpush3.bf16.msra.mxu0 %v1112_v0  ;;  %s993_s20 = sshll.u32 %s288_s17, 4  ;;  %s994_s29 = sshll.u32 %s288_s17, 5  ;;  %v1118_v11 = vld [vmem:[%s1484_s2 + $0x8] sm:$0xff]   ;;  %v1119_v12 = vld [vmem:[%s1484_s2] sm:$0xff]   ;;  %v501_v58 = vld [vmem:[%s1487_s5 + $0x10] sm:$0xff]  ;;  %vm834_vm5 = vcmask 785408  }
  0x16   : > { %1020 = vmatprep.subr.bf16.mxu0 %v1113_v1  ;;  %s1314_s23 = scalar_lea.vmem %s1482_s0, %s993_s20  ;;  %s296_s15 = scalar_lea.vmem %s1483_s1, %s994_s29  ;;  %v499_v57 = vld [vmem:[%s1487_s5] sm:$0xff]  ;;  %v500_v62 = vld [vmem:[%s1487_s5 + $0x8] sm:$0xff] }
  0x17   : > { %v1120_v4 = vld [vmem:[%s1314_s23] sm:$0xff]   ;;  %v429_v5 = vld [vmem:[%s296_s15 + $0x10] sm:$0xff]  ;;  %s1202_s17 = smov 16   ;;  %v430_v8 = vld [vmem:[%s296_s15 + $0x18] sm:$0xff]  ;;  %s1206_s29 = smov 8  }
  0x18   : > { %1034 = vmatprep.mubr.bf16.mxu0 %v1120_v4  ;;  %v427_v6 = vld [vmem:[%s296_s15] sm:$0xff]  ;;  %463 = vrot.lane.b32.xlu0 %v429_v5, %s1202_s17  ;;  %v428_v9 = vld [vmem:[%s296_s15 + $0x8] sm:$0xff] }
  0x19   : > { %1021 = vmatpush3.bf16.msra.mxu0 %v1113_v1  ;;  %459 = vrot.lane.b32.xlu1 %v427_v6, %s1202_s17  ;;  %v1121_v13 = vld [vmem:[%s1314_s23 + $0x8] sm:$0xff]   ;;  %s1204_s23 = smov 112   ;;  %v502_v1 = vld [vmem:[%s1487_s5 + $0x18] sm:$0xff] }
  0x1a   : > { %1022 = vmatprep.subr.bf16.mxu0 %v1114_v2 }
  0x1c   : > { %465 = vrot.lane.b32.xlu0 %v430_v8, %s1202_s17 }
  0x1d   : > { %1023 = vmatpush3.bf16.msra.mxu0 %v1114_v2  ;;  %461 = vrot.lane.b32.xlu1 %v428_v9, %s1202_s17 }
  0x1e   : > { %1024 = vmatprep.subr.bf16.mxu0 %v1115_v3 }
  0x21   : > { %1025 = vmatpush3.bf16.msra.mxu0 %v1115_v3 }
  0x22   : > { %1026 = vmatprep.subr.bf16.mxu0 %v1116_v7 }
  0x25   : > { %1027 = vmatpush3.bf16.msra.mxu0 %v1116_v7 }
  0x26   : > { %1028 = vmatprep.subr.bf16.mxu0 %v1117_v10 }
  0x29   : > { %1029 = vmatpush3.bf16.msra.mxu0 %v1117_v10 }
  0x2a   : > { %1030 = vmatprep.subr.bf16.mxu0 %v1118_v11 }
  0x2d   : > { %1031 = vmatpush3.bf16.msra.mxu0 %v1118_v11 }
  0x2e   : > { %1032 = vmatprep.subr.bf16.mxu0 %v1119_v12 }
  0x31   : > { %1033 = vmatpush3.bf16.msra.mxu0 %v1119_v12 }
  0x34   : > { %1035 = vmatmul.mubr.bf16.vlgmr.msra.gmra.mxu0 %v1121_v13 }
  0x8a   : > { %v464_v14 = vpop.permute.xlu0 %463 }
  0x8b   : > { %v460_v16 = vpop.permute.xlu1 %459 }
  0x8e   : > { %v466_v19 = vpop.permute.xlu0 %465 }
  0x8f   : > { %v462_v24 = vpop.permute.xlu1 %461 }
  0xf4   : > { %v1340_v15 = vpop.f32.mrf.mxu0 }
  0xf5   : > { %v473_v17 = vmul.f32 %v1340_v15, %v464_v14  ;;  %v433_v40 = vmul.f32 %v1340_v15, %v429_v5 }
  0xf6   : > { %v1343_v18 = vpop.f32.mrf.mxu0 }
  0xf7   : > { %483 = vrot.lane.b32.xlu0 %v473_v17, %s1203_s9  ;;  %v471_v21 = vmul.f32 %v460_v16, %v1343_v18  ;;  %v431_v38 = vmul.f32 %v427_v6, %v1343_v18 }
  0xf8   : > { %v1346_v20 = vpop.f32.mrf.mxu0 }
  0xf9   : > { %v474_v22 = vmul.f32 %v1346_v20, %v466_v19  ;;  %v619_v23 = vpack.c.bf16 %v1346_v20, %v1340_v15  ;;  %v434_v41 = vmul.f32 %v1346_v20, %v430_v8 }
  0xfa   : > { %v1352_v25 = vpop.f32.mrf.mxu0 }
  0xfb   : > { %v618_v26 = vpack.c.bf16 %v1352_v25, %v1343_v18  ;;  %479 = vrot.lane.b32.xlu0 %v471_v21, %s1203_s9  ;;  %485 = vrot.lane.b32.xlu1 %v474_v22, %s1203_s9  ;;  %v472_v27 = vmul.f32 %v462_v24, %v1352_v25  ;;  %v432_v28 = vmul.f32 %v428_v9, %v1352_v25 }
  0xff   : > { %481 = vrot.lane.b32.xlu1 %v472_v27, %s1203_s9 }
 0x103   : > { %441 = vrot.lane.b32.xlu1 %v432_v28, %s1203_s9 }
 0x169   : > { %v484_v29 = vpop.permute.xlu0 %483 }
 0x16a   : > { %v493_v31 = vadd.f32 %v484_v29, %v473_v17 }
 0x16d   : > { %v486_v30 = vpop.permute.xlu1 %485  ;;  %v480_v33 = vpop.permute.xlu0 %479 }
 0x16e   : > { %v494_v32 = vadd.f32 %v486_v30, %v474_v22  ;;  %v491_v36 = vadd.f32 %v480_v33, %v471_v21 }
 0x170   : > { %v498_v34 = vpack.c.bf16 %v494_v32, %v493_v31 }
 0x171   : > { %v482_v35 = vpop.permute.xlu1 %481 }
 0x172   : > { %v492_v37 = vadd.f32 %v482_v35, %v472_v27  ;;  %507 = vrot.lane.b32.xlu0 %v498_v34, %s1204_s23 }
 0x174   : > { %v497_v39 = vpack.c.bf16 %v492_v37, %v491_v36 }
 0x175   : > { %v442_v42 = vpop.permute.xlu1 %441 }
 0x176   : > { %439 = vrot.lane.b32.xlu0 %v431_v38, %s1203_s9  ;;  %505 = vrot.lane.b32.xlu1 %v497_v39, %s1204_s23  ;;  %v452_v47 = vadd.f32 %v442_v42, %v432_v28  ;;  %s1207_s23 = smov 24  }
 0x17a   : > { %443 = vrot.lane.b32.xlu0 %v433_v40, %s1203_s9  ;;  %445 = vrot.lane.b32.xlu1 %v434_v41, %s1203_s9  ;;  %s1209_s9 = smov 32  }
 0x1e4   : > { %v508_v43 = vpop.permute.xlu0 %507 }
 0x1e5   : > { %1062 = vmatprep.subr.msk.bf16.mxu1 %vm509_vm0, %v508_v43  ;;  %v520_v44 = vsel %vm509_vm0, %v508_v43, 0 }
 0x1e6   : > { %1039 = vmatpush3.bf16.xpose.msra.mxu1 %v520_v44 }
 0x1e8   : > { %v440_v45 = vpop.permute.xlu0 %439  ;;  %v506_v46 = vpop.permute.xlu1 %505 }
 0x1e9   : > { %v451_v48 = vadd.f32 %v440_v45, %v431_v38  ;;  %1063 = vmatprep.subr.msk.bf16.mxu1 %vm509_vm0, %v506_v46  ;;  %v517_v52 = vsel %vm509_vm0, %v506_v46, 0 }
 0x1eb   : > { %v495_v49 = vpack.c.bf16 %v452_v47, %v451_v48  ;;  %v1122_v47 = vld [vmem:[%s1485_s3 + $0x8] sm:$0xff]  }
 0x1ec   : > { %v444_v50 = vpop.permute.xlu0 %443  ;;  %v446_v51 = vpop.permute.xlu1 %445 }
 0x1ed   : > { %1042 = vmatprep.mubr.msk.bf16.mxu1 %vm509_vm0, %v495_v49  ;;  %v453_v53 = vadd.f32 %v444_v50, %v433_v40  ;;  %v454_v54 = vadd.f32 %v446_v51, %v434_v41  ;;  %v1123_v49 = vld [vmem:[%s1485_s3] sm:$0xff]  }
 0x1ee   : > { %1041 = vmatpush3.bf16.xpose.msra.mxu1 %v517_v52 }
 0x1ef   : > { %v496_v55 = vpack.c.bf16 %v454_v54, %v453_v53 }
 0x1f5   : > { %1043 = vmatmul.mubr.msk.bf16.vlgmr.msra.gmra.mxu1 %vm509_vm0, %v496_v55 }
 0x2b5   : > { %v1044_v56 = vpop.f32.mrf.mxu1 }
 0x2b6   : > { %v565_v63 = vadd.f32 %v1044_v56, %v501_v58 }
 0x2b7   : > { %v556_v59 = vpop.f32.mrf.mxu1 }
 0x2b8   : > { %v557_v60 = vadd.f32 %v556_v59, %v499_v57  ;;  %v578_v6 = vsel %vm571_vm1, %v565_v63, -inf }
 0x2b9   : > { %v1045_v61 = vpop.f32.mrf.mxu1 }
 0x2ba   : > { %v572_v0 = vsel %vm571_vm1, %v557_v60, -inf  ;;  %v568_v4 = vadd.f32 %v1045_v61, %v502_v1  ;;  %v737_v61 = vld [vmem:[%s1486_s4] sm:$0xff] }
 0x2bb   : > { %v559_v2 = vpop.f32.mrf.mxu1  ;;  %573 = vmax.xlane.f32.xlu0 %v572_v0  ;;  %v738_v0 = vld [vmem:[%s1486_s4 + $0x8] sm:$0xff] }
 0x2bc   : > { %v560_v3 = vadd.f32 %v559_v2, %v500_v62  ;;  %v581_v7 = vsel %vm571_vm1, %v568_v4, -inf }
 0x2be   : > { %v575_v5 = vsel %vm571_vm1, %v560_v3, -inf }
 0x2bf   : > { %576 = vmax.xlane.f32.xlu1 %v575_v5  ;;  %579 = vmax.xlane.f32.xlu0 %v578_v6 }
 0x2c3   : > { %582 = vmax.xlane.f32.xlu0 %v581_v7 }
 0x344   : > { %v574_v8 = vpop.xlane.xlu0 %573 }
 0x345   : > { %v584_v9 = vsub.f32 %v557_v60, %v574_v8 }
 0x347   : > { %v588_v16 = vmul.f32 1.442695, %v584_v9 }
 0x348   : > { %v577_v10 = vpop.xlane.xlu1 %576  ;;  %v580_v11 = vpop.xlane.xlu0 %579 }
 0x349   : > { %v586_v12 = vsub.f32 %v565_v63, %v580_v11  ;;  %v585_v13 = vsub.f32 %v560_v3, %v577_v10  ;;  %v739_v10 = vld [vmem:[%s1486_s4 + $0x10] sm:$0xff] }
 0x34b   : > { %v592_v14 = vmul.f32 1.442695, %v586_v12  ;;  %v590_v21 = vmul.f32 1.442695, %v585_v13  ;;  %v740_v12 = vld [vmem:[%s1486_s4 + $0x18] sm:$0xff] }
 0x34c   : > { %v583_v17 = vpop.xlane.xlu0 %582 }
 0x34d   : > { %v587_v19 = vsub.f32 %v568_v4, %v583_v17  ;;  %1124 = vpow2.f32 %v592_v14 }
 0x34e   : > { %1126 = vpow2.f32 %v588_v16 }
 0x34f   : > { %v594_v22 = vmul.f32 1.442695, %v587_v19 }
 0x351   : > { %1128 = vpow2.f32 %v594_v22 }
 0x352   : > { %1130 = vpow2.f32 %v590_v21 }
 0x35a   : > { %v1125_v24 = vpop.eup %1124 }
 0x35b   : > { %v602_v27 = vsel %vm571_vm1, %v1125_v24, 0.0  ;;  %v1127_v28 = vpop.eup %1126 }
 0x35c   : > { %603 = vadd.xlane.f32.xlu1 %v602_v27  ;;  %v596_v32 = vsel %vm571_vm1, %v1127_v28, 0.0 }
 0x35e   : > { %v1129_v29 = vpop.eup %1128 }
 0x35f   : > { %v605_v30 = vsel %vm571_vm1, %v1129_v29, 0.0  ;;  %v1131_v31 = vpop.eup %1130 }
 0x360   : > { %606 = vadd.xlane.f32.xlu0 %v605_v30  ;;  %597 = vadd.xlane.f32.xlu1 %v596_v32  ;;  %v599_v33 = vsel %vm571_vm1, %v1131_v31, 0.0 }
 0x364   : > { %600 = vadd.xlane.f32.xlu0 %v599_v33 }
 0x371   : > { %624 = vrot.lane.b32.xlu1 %v619_v23, %s1205_s22 }
 0x37a   : > { %622 = vrot.lane.b32.xlu0 %v618_v26, %s1205_s22 }
 0x3e5   : > { %v604_v34 = vpop.xlane.xlu1 %603 }
 0x3e9   : > { %v607_v35 = vpop.xlane.xlu0 %606  ;;  %v598_v36 = vpop.xlane.xlu1 %597 }
 0x3ea   : > { %1132 = vrcp.f32 %v607_v35 }
 0x3eb   : > { %1134 = vrcp.f32 %v598_v36  ;;  %v836_v36 = vld [vmem:[%s1488_s6] sm:$0xff] }
 0x3ec   : > { %1136 = vrcp.f32 %v604_v34 }
 0x3ed   : > { %v601_v37 = vpop.xlane.xlu0 %600  ;;  %v625_v38 = vpop.permute.xlu1 %624 }
 0x3ee   : > { %1138 = vrcp.f32 %v601_v37  ;;  %1046 = vmatprep.subr.bf16.mxu1 %v625_v38  ;;  %v837_v37 = vld [vmem:[%s1488_s6 + $0x8] sm:$0xff] }
 0x3ef   : > { %1047 = vmatpush3.bf16.msra.mxu1 %v625_v38 }
 0x3f1   : > { %v623_v39 = vpop.permute.xlu0 %622 }
 0x3f2   : > { %1048 = vmatprep.subr.bf16.mxu1 %v623_v39 }
 0x3f3   : > { %1049 = vmatpush3.bf16.msra.mxu1 %v623_v39 }
 0x3f4   : > { %1054 = vmatprep.subr.bf16.mxu1 %v1122_v47 }
 0x3f7   : > { %v1133_v15 = vpop.eup %1132 }
 0x3f8   : > { %v1135_v20 = vpop.eup %1134  ;;  %v615_v18 = vmul.f32 %v1133_v15, %v1129_v29 }
 0x3f9   : > { %v1137_v23 = vpop.eup %1136  ;;  %v612_v25 = vmul.f32 %v1135_v20, %v1127_v28 }
 0x3fa   : > { %v614_v41 = vmul.f32 %v1137_v23, %v1125_v24 }
 0x3fb   : > { %v1139_v40 = vpop.eup %1138 }
 0x3fc   : > { %v613_v26 = vmul.f32 %v1139_v40, %v1131_v31  ;;  %v617_v43 = vpack.c.bf16 %v615_v18, %v614_v41  ;;  %v1210_v41 = vmov 1966171168  }
 0x3fe   : > { %v616_v42 = vpack.c.bf16 %v613_v26, %v612_v25 }
 0x400   : > { %1050 = vmatprep.mubr.msk.bf16.mxu1 %vm571_vm1, %v616_v42  ;;  %v856_v42 = vunpack.c.l.s4 %v1210_v41 }
 0x401   : > { %1051 = vmatmul.mubr.msk.bf16.vlgmr.msra.gmra.mxu1 %vm571_vm1, %v617_v43  ;;  %v858_v43 = vlaneseq }
 0x402   : > { %1055 = vmatpush3.bf16.msra.mxu1 %v1122_v47 }
 0x403   : > { %1056 = vmatprep.subr.bf16.mxu1 %v1123_v49  ;;  %vm872_vm6 = vcmp.lt.s32.totalorder %v858_v43, 256 }
 0x406   : > { %1057 = vmatpush3.bf16.msra.mxu1 %v1123_v49  ;;  %v859_v49 = vshrl.u32 %v858_v43, 7 }
 0x4c1   : > { %v1052_v44 = vpop.f32.mrf.mxu1 }
 0x4c2   : > { %691 = vrot.lane.b32.xlu0 %v1052_v44, %s1206_s29 }
 0x4c3   : > { %v668_v45 = vpop.f32.mrf.mxu1 }
 0x4c4   : > { %687 = vrot.lane.b32.xlu1 %v668_v45, %s1206_s29 }
 0x4c5   : > { %v1053_v46 = vpop.f32.mrf.mxu1 }
 0x4c6   : > { %703 = vrot.lane.b32.xlu0 %v1052_v44, %s1202_s17 }
 0x4c7   : > { %v671_v48 = vpop.f32.mrf.mxu1 }
 0x4c8   : > { %693 = vrot.lane.b32.xlu1 %v1053_v46, %s1206_s29 }
 0x4ca   : > { %699 = vrot.lane.b32.xlu0 %v668_v45, %s1202_s17 }
 0x4cc   : > { %705 = vrot.lane.b32.xlu1 %v1053_v46, %s1202_s17 }
 0x4ce   : > { %711 = vrot.lane.b32.xlu0 %v668_v45, %s1207_s23 }
 0x4d0   : > { %689 = vrot.lane.b32.xlu1 %v671_v48, %s1206_s29 }
 0x4d2   : > { %715 = vrot.lane.b32.xlu0 %v1052_v44, %s1207_s23 }
 0x4d4   : > { %701 = vrot.lane.b32.xlu1 %v671_v48, %s1202_s17  ;;  %s995_s17 = sshll.u32 %s1273_s28, 5 }
 0x4d5   : > { %s888_s29 = scalar_lea.hbm %s1489_s7, %s995_s17 }
 0x4d8   : > { %713 = vrot.lane.b32.xlu1 %v671_v48, %s1207_s23 }
 0x4dc   : > { %717 = vrot.lane.b32.xlu1 %v1053_v46, %s1207_s23  ;;  %s1211_s23 = smov [#allocation2]  }
 0x4dd   : > { %s1144_s13 = sshll.u32 %s1211_s23, 4  ;;  %s1145_s13 = int_to_ptr.vmem [resolvable:$false] %s1144_s13 }
 0x4de   : > { %s1146_s28 = scalar_lea.vmem %s1145_s13, 64 }
 0x534   : > { %v692_v50 = vpop.permute.xlu0 %691 }
 0x535   : > { %v725_v4 = vsel %vm509_vm0, %v1052_v44, %v692_v50 }
 0x536   : > { %v688_v51 = vpop.permute.xlu1 %687 }
 0x537   : > { %v723_v59 = vsel %vm509_vm0, %v668_v45, %v688_v51 }
 0x538   : > { %v704_v52 = vpop.permute.xlu0 %703 }
 0x539   : > { %v730_v6 = vsel %vm727_vm3, %v725_v4, %v704_v52 }
 0x53a   : > { %v694_v53 = vpop.permute.xlu1 %693 }
 0x53b   : > { %v726_v9 = vsel %vm509_vm0, %v1053_v46, %v694_v53 }
 0x53c   : > { %v700_v54 = vpop.permute.xlu0 %699 }
 0x53d   : > { %v728_v60 = vsel %vm727_vm3, %v723_v59, %v700_v54 }
 0x53e   : > { %v706_v55 = vpop.permute.xlu1 %705 }
 0x53f   : > { %v731_v13 = vsel %vm727_vm3, %v726_v9, %v706_v55 }
 0x540   : > { %v712_v57 = vpop.permute.xlu0 %711 }
 0x541   : > { %v733_v62 = vsel %vm732_vm2, %v728_v60, %v712_v57 }
 0x542   : > { %v690_v56 = vpop.permute.xlu1 %689  ;;  %v741_v7 = vmul.f32 %v737_v61, %v733_v62 }
 0x543   : > { %v724_v63 = vsel %vm509_vm0, %v671_v48, %v690_v56  ;;  %v857_v48 = vunpack.c.0.s8 %v856_v42 }
 0x544   : > { %v716_v1 = vpop.permute.xlu0 %715 }
 0x545   : > { %v735_v11 = vsel %vm732_vm2, %v730_v6, %v716_v1  ;;  %v860_v54 = vsub.s32 %v857_v48, %v859_v49 }
 0x546   : > { %v702_v58 = vpop.permute.xlu1 %701  ;;  %v743_v19 = vmul.f32 %v739_v10, %v735_v11 }
 0x547   : > { %v729_v2 = vsel %vm727_vm3, %v724_v63, %v702_v58 }
 0x54a   : > { %v714_v3 = vpop.permute.xlu1 %713 }
 0x54b   : > { %v734_v5 = vsel %vm732_vm2, %v729_v2, %v714_v3 }
 0x54c   : > { %v742_v8 = vmul.f32 %v738_v0, %v734_v5 }
 0x54e   : > { %v745_v14 = vpack.c.bf16 %v742_v8, %v741_v7  ;;  %v718_v16 = vpop.permute.xlu1 %717 }
 0x54f   : > { %v736_v17 = vsel %vm732_vm2, %v731_v13, %v718_v16 }
 0x550   : > { %v744_v21 = vmul.f32 %v740_v12, %v736_v17  ;;  %1058 = vmatprep.mubr.msk.bf16.mxu1 %vm571_vm1, %v745_v14 }
 0x552   : > { %v746_v22 = vpack.c.bf16 %v744_v21, %v743_v19 }
 0x554   : > { %1059 = vmatmul.mubr.msk.bf16.vlgmr.msra.gmra.mxu1 %vm571_vm1, %v746_v22 }
 0x614   : > { %v1060_v24 = vpop.f32.mrf.mxu1 }
 0x616   : > { %v803_v27 = vpop.f32.mrf.mxu1 }
 0x618   : > { %v1061_v28 = vpop.f32.mrf.mxu1 }
 0x61a   : > { %v806_v29 = vpop.f32.mrf.mxu1 }
 0x61b   : > { %v818_v30 = vadd.f32 %v806_v29, %v803_v27 }
 0x61d   : > { %v819_v31 = vadd.f32 %v1060_v24, %v818_v30 }
 0x61f   : > { %v820_v32 = vadd.f32 %v1061_v28, %v819_v31 }
 0x621   : > { %825 = vrot.lane.b32.xlu1 %v820_v32, %s1208_s8  ;;  %822 = vrot.lane.b32.xlu0 %v820_v32, %s1209_s9 }
 0x625   : > { %828 = vrot.lane.b32.xlu0 %v820_v32, %s1205_s22  ;;  %s284_s22 = sand.u32 1, %s1192_s25  }
 0x626   : > { %s965_s16 = sshll.u32 %s284_s22, 1  ;;  %s876_s8 = scalar_lea.sflag [#allocation3], %s284_s22 }
 0x627   : > { %s286_s18 = scalar_lea.vmem [#allocation2], %s965_s16 }
 0x628   : > { %s890_s19 = sshll.u32 %s286_s18, 4  ;;  %s891_s19 = int_to_ptr.vmem [resolvable:$true] %s890_s19 }
 0x629   : > { %s1140_s9 = scalar_lea.vmem %s891_s19, 32  ;;  %p1147_p0 = scmp.lt.s32.totalorder %s891_s19, %s1145_s13 }
 0x62a   : > { %p1141_p11 = scmp.ne.s32.totalorder %s891_s19, %s1140_s9  ;;  %p1148_p1 = scmp.lt.s32.totalorder %s1146_s28, %s1140_s9 }
 0x62c   : > { %p1142_p12 = pnand %p1141_p11, %p1290_p5  ;;  %p1149_p2 = por %p1148_p1, %p1147_p0 }
 0x62e   : > { %p1143_p13 = pneg %p1142_p12 }
 0x630   : > { %p1150_p3 = pnand %p1149_p2, %p1143_p13 }
 0x693   : > { %v823_v33 = vpop.permute.xlu0 %822  ;;  %v826_v34 = vpop.permute.xlu1 %825 }
 0x694   : > { %v831_v35 = vsel %vm571_vm1, %v820_v32, %v823_v33 }
 0x695   : > { %v833_v38 = vsel %vm832_vm4, %v831_v35, %v826_v34 }
 0x697   : > { %v829_v39 = vpop.permute.xlu0 %828 }
 0x698   : > { %v835_v15 = vsel %vm834_vm5, %v833_v38, %v829_v39 }
 0x699   : > { %v838_v20 = vmul.f32 %v836_v36, %v835_v15  ;;  %v839_v23 = vmul.f32 %v837_v37, %v835_v15 }
 0x69b   : > { %v840_v40 = vrot.slane %v838_v20, 4  ;;  %v846_v18 = vrot.slane %v839_v23, 4 }
 0x69d   : > { %v841_v25 = vadd.f32 %v840_v40, %v838_v20  ;;  %v847_v26 = vadd.f32 %v846_v18, %v839_v23 }
 0x69f   : > { %v842_v44 = vrot.slane %v841_v25, 2  ;;  %v848_v45 = vrot.slane %v847_v26, 2 }
 0x6a1   : > { %v843_v46 = vadd.f32 %v842_v44, %v841_v25  ;;  %v849_v47 = vadd.f32 %v848_v45, %v847_v26 }
 0x6a3   : > { %v844_v50 = vrot.slane %v843_v46, 1  ;;  %v850_v51 = vrot.slane %v849_v47, 1 }
 0x6a5   : > { %v845_v52 = vadd.f32 %v844_v50, %v843_v46  ;;  %v851_v53 = vadd.f32 %v850_v51, %v849_v47 }
 0x6a7   : > { %v854_v55 = vcombine.low %v845_v52, %v851_v53 }
 0x6a9   : > { %v861_v56 = vrot.slane %v854_v55, %v860_v54 }
 0x6ab   : > { %v868_v57 = vrot.slane %v861_v56, %v860_v54 }
 0x6ad   : > { %874 = vst.msk [vmem:[%s286_s18] sm:$0x3] %vm872_vm6, %v868_v57 }
 0x6ae   : > { %1153 = shalt.err (!%p1150_p3)
}
 0x6af   : > { %s1154_s14 = scalar_lea.hbm %s888_s29, 32  ;;  %s1158_s16 = scalar_lea.hbm %s1489_s7, 64 }
 0x6b0   : > { %p1155_p4 = scmp.ne.s32.totalorder %s888_s29, %s1154_s14  ;;  %p1159_p9 = scmp.lt.s32.totalorder %s888_s29, %s1489_s7 }
 0x6b1   : > { %p1160_p10 = scmp.lt.s32.totalorder %s1158_s16, %s1154_s14 }
 0x6b2   : > { %p1156_p7 = pnand %p1155_p4, %p1290_p5 }
 0x6b3   : > { %p1161_p11 = por %p1160_p10, %p1159_p9 }
 0x6b4   : > { %p1157_p8 = pneg %p1156_p7 }
 0x6b6   : > { %p1162_p12 = pnand %p1161_p11, %p1157_p8 }
 0x6b8   : > { %1165 = shalt.err (!%p1162_p12)
}
 0x6b9   : > { %1064 = dma.vmem_to_hbm [thread:$0]  (%p1290_p5), %s891_s19, 32, %s888_s29, %s876_s8  }
 0x6ba PF: > { %p1070_p13 = scmp.ge.s32.totalorder %s1200_s27, 2  ;;  %s902_s20 = sand.u32 1, %s1188_s24  }
 0x6bb   : > { %s903_s21 = scalar_lea.sflag [#allocation3], %s902_s20 }
 0x6bc   : > { %p1067_p0 = pnand %p1070_p13, %p1294_p6 }
 0x6be   : > { %p1068_p1 = pneg %p1067_p0 }
 0x6c0   : > { %1183 = dma.done.wait (%p1068_p1), %s903_s21, 32  }
 0x6c1   : > { %1185 = vsyncadd (%p1068_p1), %s903_s21, 4294967264  ;;  %p17_p2 = scmp.ge.s32.totalorder %s1277_s30, 4   ;;  %s1492_s24 = smov %s1192_s25 }
 0x6c2   : > { %s1493_s25 = smov %s1196_s26  ;;  %s1494_s26 = smov %s1288_s10 }
 0x6c3   : > { %s1495_s27 = smov %s1277_s30  ;;  %19 = sbr.rel (!%p17_p2) target bundleno = 3 (0x3), region = 86 }
 0x6c8   :  { %908 = vsyncpa [#allocation3], 1 }
 0x6c9   :  { %910 = vsyncpa [#allocation3 + $0x1], 1 }

</bundles_post_ra>
